<compile_context>
chip_gen: v7x
topology: tpu7x:2x2x1
jax: 0.10.0
libtpu: 0.0.40
codegen_flags: <defaults>
</compile_context>

<pallas_src>
import functools

import jax
import jax.numpy as jnp
from jax.experimental import pallas as pl
from jax.experimental.pallas import tpu as pltpu


def _round_up(x, m):
    return ((x + m - 1) // m) * m


def _vmem_capacity_bytes():
    try:
        info = pltpu.get_tpu_info()
        cap = getattr(info, "vmem_capacity_bytes", None)
        if cap:
            return int(cap)
    except Exception:
        pass
    return 128 << 20  # v5e/v6e default if query unavailable


# ----------------------------------------------------------------------------
# Pallas kernel: per-pixel focal loss + fg/total partial reduction (per tile)
# ----------------------------------------------------------------------------
def _focal_balance_kernel(logits_ref, tgt_ref, fg_ref, fg_out_ref, tot_out_ref,
                          *, alpha, gamma, hw):
    t = pl.program_id(1)
    _, c, tl = logits_ref.shape
    c8 = (c // 8) * 8

    # Read the depth-bin axis in sublane-tile aligned pieces so C=9 does not
    # force every op onto a half-empty second (8,128) sublane tile.
    pieces = []
    if c8 > 0:
        pieces.append((0, logits_ref[0, 0:c8, :].astype(jnp.float32)))
    if c8 < c:
        pieces.append((c8, logits_ref[0, c8:c, :].astype(jnp.float32)))

    tgt = tgt_ref[0]                                            # (1, tl) int32

    # Numerically stable log-sum-exp over the (sublane) bin axis.
    m = None
    for _, x in pieces:
        mx = jnp.max(x, axis=0, keepdims=True)                  # (1, tl)
        m = mx if m is None else jnp.maximum(m, mx)

    # Single exp pass: reuse e for both the LSE denominator and p_t numerator.
    sumexp = x_t = e_t = None
    for off, x in pieces:
        e = jnp.exp(x - m)
        onehot = (jax.lax.broadcasted_iota(jnp.int32, x.shape, 0) + off) == tgt
        se = jnp.sum(e, axis=0, keepdims=True)
        xt = jnp.sum(jnp.where(onehot, x, 0.0), axis=0, keepdims=True)
        et = jnp.sum(jnp.where(onehot, e, 0.0), axis=0, keepdims=True)
        if sumexp is None:
            sumexp, x_t, e_t = se, xt, et
        else:
            sumexp, x_t, e_t = sumexp + se, x_t + xt, e_t + et

    log_p_t = x_t - (m + jnp.log(sumexp))                       # <= 0
    p_t = e_t * pl.reciprocal(sumexp, approx=True)              # EUP slot, ~free

    one_m = 1.0 - p_t
    if gamma == 2.0:                                            # CaDDN default
        pow_term = one_m * one_m
    elif float(gamma).is_integer() and gamma >= 0.0:
        pow_term = jnp.ones_like(one_m)
        for _ in range(int(gamma)):
            pow_term = pow_term * one_m
    else:                                                       # EUP pow fallback
        pow_term = jnp.power(jnp.maximum(one_m, 0.0), gamma)
    loss_px = (-alpha) * pow_term * log_p_t                     # (1, tl)

    # Mask lanes past the image end.  Must stay a SELECT (not a multiply):
    # padded lanes hold undefined HBM/VMEM bytes (possibly NaN/Inf as f32).
    lane = jax.lax.broadcasted_iota(jnp.int32, (1, tl), 1)
    valid = (t * tl + lane) < hw
    loss_v = jnp.where(valid, loss_px, 0.0)
    fg_v = jnp.where(valid, fg_ref[0], 0.0)

    # Per-tile lane-dense outputs (no cross-step accumulation -> both grid
    # axes can be megacore-parallel).
    fg_out_ref[...] = (fg_v * loss_v)[None, None]
    tot_out_ref[...] = loss_v[None, None]


def focal_balance_pallas(logits, tgt, fg, *, alpha, gamma, tl=None):
    """logits: (B, C, HW) f32 or bf16; tgt: (B, 1, HW) int32;
    fg: (B, 1, HW) float32 in {0,1}.
    Returns (fg_part, tot_part): two (B, n_tiles, 1, TL) partial-sum slabs."""
    b, c, hw = logits.shape
    hw128 = _round_up(hw, 128)
    vmem_cap = _vmem_capacity_bytes()

    if tl is None:
        # Large tiles amortize the ~0.35us/step overhead; cap by chip VMEM
        # (v7x has half the VMEM of v5e/v6e).
        cap = 16384 if vmem_cap <= (64 << 20) else 32768
        tl = min(cap, hw128)
    tl = max(128, min(_round_up(tl, 128), hw128))
    # Ensure >= 2 grid steps so both v7x TensorCores get work even when B==1.
    if b * pl.cdiv(hw, tl) < 2 and hw128 >= 256:
        tl = max(128, min(tl, _round_up(pl.cdiv(hw128, 2), 128)))
    n_tiles = pl.cdiv(hw, tl)

    # Scoped-VMEM budget: double-buffered inputs/outputs + (C,TL) f32
    # temporaries.  Only raise the limit when the default would be tight,
    # keeping headroom vs. physical VMEM (important on v7x).
    itemsize = jnp.dtype(logits.dtype).itemsize
    est = (2 * (c * tl * itemsize + 2 * tl * 4 + 2 * tl * 4)
           + 12 * c * tl * 4 + (2 << 20))
    vmem_limit = None
    if est > (32 << 20):
        vmem_limit = int(min(est + (8 << 20), int(0.9 * vmem_cap)))

    kernel = functools.partial(_focal_balance_kernel, alpha=float(alpha),
                               gamma=float(gamma), hw=hw)
    fg_part, tot_part = pl.pallas_call(
        kernel,
        out_shape=(jax.ShapeDtypeStruct((b, n_tiles, 1, tl), jnp.float32),
                   jax.ShapeDtypeStruct((b, n_tiles, 1, tl), jnp.float32)),
        grid_spec=pltpu.PrefetchScalarGridSpec(
            num_scalar_prefetch=0,
            grid=(b, n_tiles),
            in_specs=[
                pl.BlockSpec((1, c, tl), lambda i, j: (i, 0, j)),
                pl.BlockSpec((1, 1, tl), lambda i, j: (i, 0, j)),
                pl.BlockSpec((1, 1, tl), lambda i, j: (i, 0, j)),
            ],
            out_specs=[
                pl.BlockSpec((1, 1, 1, tl), lambda i, j: (i, j, 0, 0)),
                pl.BlockSpec((1, 1, 1, tl), lambda i, j: (i, j, 0, 0)),
            ],
        ),
        compiler_params=pltpu.CompilerParams(
            dimension_semantics=("parallel", "parallel"),
            vmem_limit_bytes=vmem_limit),
    )(logits, tgt, fg)
    return fg_part, tot_part


# ----------------------------------------------------------------------------
# Plain-JAX glue: depth discretization + one-shot box rasterization
# ----------------------------------------------------------------------------
def bin_depths(depth_map, mode, depth_min, depth_max, num_bins, target=True):
    if mode == "UD":
        bin_size = (depth_max - depth_min) / num_bins
        indices = (depth_map - depth_min) / bin_size
    elif mode == "LID":
        bin_size = 2.0 * (depth_max - depth_min) / (num_bins * (1 + num_bins))
        indices = -0.5 + 0.5 * jnp.sqrt(1.0 + 8.0 * (depth_map - depth_min) / bin_size)
    elif mode == "SID":
        indices = num_bins * (jnp.log(1.0 + depth_map) - jnp.log(1.0 + depth_min)) / \
            (jnp.log(1.0 + depth_max) - jnp.log(1.0 + depth_min))
    else:
        raise NotImplementedError(mode)
    if target:
        bad = (indices < 0) | (indices > num_bins) | (~jnp.isfinite(indices))
        indices = jnp.where(bad, float(num_bins), indices)
        indices = indices.astype(jnp.int32)   # truncation == floor (non-negative)
    return indices


def compute_fg_voxel_masks(gt_boxes2d, shape, downsample_factor, bin_nums,
                           depth_target):
    """Scan-free Balancer.compute_fg_mask.

    Net effect of the torch per-box loop is, per pixel:
      fg        = union of box coverage,
      voxel     = union over covering (has_valid) boxes of their depth window,
                  zeroed wherever the pixel's own depth bin is invalid.
    That union is computed with one batched (pixels x boxes) @ (boxes x bins)
    contraction instead of a lax.scan rewriting the (B,H,W,bins-1) carry N
    times (which dominated HBM traffic of the whole forward pass).
    gt_boxes2d: (B, N, 4) float boxes (u1, v1, u2, v2)."""
    B, H, W = shape
    boxes = gt_boxes2d.astype(jnp.float32) / float(downsample_factor)
    u1 = jnp.floor(boxes[..., 0]).astype(jnp.int32)   # (B, N)
    v1 = jnp.floor(boxes[..., 1]).astype(jnp.int32)
    u2 = jnp.ceil(boxes[..., 2]).astype(jnp.int32)
    v2 = jnp.ceil(boxes[..., 3]).astype(jnp.int32)

    vv = jnp.arange(H, dtype=jnp.int32)
    uu = jnp.arange(W, dtype=jnp.int32)
    row_in = (vv[None, None, :] >= v1[..., None]) & (vv[None, None, :] < v2[..., None])  # (B,N,H)
    col_in = (uu[None, None, :] >= u1[..., None]) & (uu[None, None, :] < u2[..., None])  # (B,N,W)
    cover = row_in[:, :, :, None] & col_in[:, :, None, :]                                # (B,N,H,W)

    # fg mask is OR-ed regardless of valid depth (torch sets it before `continue`)
    fg_mask = jnp.any(cover, axis=1)                                                     # (B,H,W)

    dt = depth_target                                   # (B,H,W) int32
    dt_valid = dt != (bin_nums - 1)
    cover_f = cover.astype(jnp.float32)
    valid_f = dt_valid.astype(jnp.float32)
    cnt = jnp.einsum('bnhw,bhw->bn', cover_f, valid_f)                                   # (B,N)
    dsum = jnp.einsum('bnhw,bhw->bn', cover_f, valid_f * dt.astype(jnp.float32))
    has_valid = cnt > 0.0
    mean_idx = (dsum / jnp.maximum(cnt, 1.0)).astype(jnp.int32)  # int() trunc, >= 0
    left = jnp.maximum(0, mean_idx - 10)
    right = jnp.minimum(bin_nums - 1, mean_idx + 18)
    bin_idx = jnp.arange(bin_nums - 1, dtype=jnp.int32)
    window = ((bin_idx[None, None, :] >= left[..., None]) &
              (bin_idx[None, None, :] < right[..., None]) &
              has_valid[..., None])                              # (B,N,bins-1)

    # voxel[b,h,w,d] = dt_valid[b,h,w] & OR_n(cover[b,n,h,w] & window[b,n,d])
    contrib = jnp.einsum('bnhw,bnd->bhwd', cover_f, window.astype(jnp.float32))
    voxel_mask = dt_valid[..., None] & (contrib > 0.5)
    return fg_mask, voxel_mask


# ----------------------------------------------------------------------------
# DepthLoss forward
# ----------------------------------------------------------------------------
def depth_loss_forward(depth_logits, depth_maps, gt_boxes2d, *, weight, alpha,
                       gamma, disc_cfg, fg_weight, bg_weight,
                       downsample_factor, cast_logits_to_bf16=False,
                       pixel_tile=None):
    B, C, H, W = depth_logits.shape
    bin_nums = C

    depth_target = bin_depths(depth_maps, target=True, **disc_cfg)   # (B,H,W) i32
    fg_mask, voxel_mask = compute_fg_voxel_masks(
        gt_boxes2d, (B, H, W), downsample_factor, bin_nums, depth_target)

    # Native NCHW view flattened to (B, C, H*W): pixels on lanes, no transpose.
    logits_flat = depth_logits.reshape(B, C, H * W)
    if cast_logits_to_bf16:
        # Halves the kernel's HBM read (mainly a v5e win); ideally the logits
        # producer emits bf16 directly so this cast fuses upstream.
        logits_flat = logits_flat.astype(jnp.bfloat16)
    tgt = depth_target.reshape(B, 1, H * W).astype(jnp.int32)
    fg = fg_mask.reshape(B, 1, H * W).astype(jnp.float32)

    fg_part, tot_part = focal_balance_pallas(logits_flat, tgt, fg,
                                             alpha=alpha, gamma=gamma,
                                             tl=pixel_tile)

    num_pixels = jnp.float32(B * H * W)      # fg_mask.sum() + bg_mask.sum()
    fg_sum = jnp.sum(fg_part)
    bg_sum = jnp.sum(tot_part) - fg_sum
    fg_loss = float(fg_weight) * fg_sum / num_pixels
    bg_loss = float(bg_weight) * bg_sum / num_pixels
    loss = (fg_loss + bg_loss) * float(weight)

    tb_dict = {"fg_loss": fg_loss, "bg_loss": bg_loss,
               "loss_depth_estimate": loss}
    return tb_dict, voxel_mask


# ----------------------------------------------------------------------------
if __name__ == "__main__":
    key = jax.random.PRNGKey(0)
    k1, k2 = jax.random.split(key)

    B, H, W = 2, 16, 16
    num_bins = 8                    # D; logits have D+1 = 9 channels
    C = num_bins + 1

    depth_logits = jax.random.normal(k1, (B, C, H, W), dtype=jnp.float32)
    depth_maps = jax.random.uniform(k2, (B, H, W), dtype=jnp.float32,
                                    minval=1.0, maxval=50.0)
    # (B, N, 4) boxes as (u1, v1, u2, v2), already in depth-map coordinates.
    gt_boxes2d = jnp.array(
        [[[2.0, 3.0, 10.0, 12.0], [5.0, 1.0, 15.0, 8.0]],
         [[0.0, 0.0, 8.0, 8.0], [4.0, 6.0, 14.0, 15.0]]], dtype=jnp.float32)

    # Deterministic hyper-parameters (CaDDN-style config).
    cfg = dict(
        weight=3.0, alpha=0.25, gamma=2.0,
        disc_cfg=dict(mode="LID", num_bins=num_bins,
                      depth_min=2.0, depth_max=46.8),
        fg_weight=13.0, bg_weight=1.0, downsample_factor=1,
    )

    tb_dict, voxel_mask = depth_loss_forward(depth_logits, depth_maps,
                                             gt_boxes2d, **cfg)
    jax.block_until_ready(tb_dict["loss_depth_estimate"])
    jax.block_until_ready(voxel_mask)

    assert voxel_mask.shape == (B, H, W, C - 1)
    assert jnp.isfinite(tb_dict["loss_depth_estimate"])
    print("KERNEL_OK")
</pallas_src>

<mosaic_0001>
module attributes {stable_mosaic.version = 11 : i64} {
  func.func @_focal_balance_kernel(%arg0: i32, %arg1: i32, %arg2: memref<1x9x256xf32, #tpu.memory_space<vmem>>, %arg3: memref<1x1x256xi32, #tpu.memory_space<vmem>>, %arg4: memref<1x1x256xf32, #tpu.memory_space<vmem>>, %arg5: memref<1x1x1x256xf32, #tpu.memory_space<vmem>>, %arg6: memref<1x1x1x256xf32, #tpu.memory_space<vmem>>) attributes {dimension_semantics = [#tpu.dimension_semantics<parallel>, #tpu.dimension_semantics<parallel>], iteration_bounds = array<i64: 2, 1>, scalar_prefetch = 0 : i64, scratch_operands = 0 : i64, tpu.core_type = #tpu.core_type<tc>, window_params = [{transform_indices = @transform_0, window_bounds = array<i64: 1, 9, 256>}, {transform_indices = @transform_1, window_bounds = array<i64: 1, 1, 256>}, {transform_indices = @transform_2, window_bounds = array<i64: 1, 1, 256>}, {transform_indices = @transform_3, window_bounds = array<i64: 1, 1, 1, 256>}, {transform_indices = @transform_4, window_bounds = array<i64: 1, 1, 1, 256>}]} {
    %c0 = arith.constant 0 : index
    %c0_0 = arith.constant 0 : index
    %c0_1 = arith.constant 0 : index
    %0 = vector.load %arg2[%c0, %c0_0, %c0_1] : memref<1x9x256xf32, #tpu.memory_space<vmem>>, vector<1x8x256xf32>
    %1 = vector.shape_cast %0 : vector<1x8x256xf32> to vector<8x256xf32>
    %c0_2 = arith.constant 0 : index
    %c8 = arith.constant 8 : index
    %c0_3 = arith.constant 0 : index
    %2 = vector.load %arg2[%c0_2, %c8, %c0_3] : memref<1x9x256xf32, #tpu.memory_space<vmem>>, vector<1x1x256xf32>
    %3 = vector.shape_cast %2 : vector<1x1x256xf32> to vector<1x256xf32>
    %c0_4 = arith.constant 0 : index
    %c0_5 = arith.constant 0 : index
    %c0_6 = arith.constant 0 : index
    %4 = vector.load %arg3[%c0_4, %c0_5, %c0_6] : memref<1x1x256xi32, #tpu.memory_space<vmem>>, vector<1x1x256xi32>
    %5 = vector.shape_cast %4 : vector<1x1x256xi32> to vector<1x256xi32>
    %cst = arith.constant dense<0xFF800000> : vector<256xf32>
    %6 = vector.multi_reduction <maximumf>, %1, %cst [0] : vector<8x256xf32> to vector<256xf32>
    %7 = vector.shape_cast %6 : vector<256xf32> to vector<1x256xf32>
    %cst_7 = arith.constant dense<0xFF800000> : vector<256xf32>
    %8 = vector.multi_reduction <maximumf>, %3, %cst_7 [0] : vector<1x256xf32> to vector<256xf32>
    %9 = vector.shape_cast %8 : vector<256xf32> to vector<1x256xf32>
    %10 = arith.maximumf %7, %9 : vector<1x256xf32>
    %11 = vector.broadcast %10 : vector<1x256xf32> to vector<8x256xf32>
    %12 = arith.subf %1, %11 : vector<8x256xf32>
    %13 = math.exp %12 : vector<8x256xf32>
    %14 = tpu.iota {dimensions = array<i32: 0>} : vector<8x256xi32>
    %c0_i32 = arith.constant 0 : i32
    %15 = vector.broadcast %c0_i32 : i32 to vector<8x256xi32>
    %16 = arith.addi %14, %15 : vector<8x256xi32>
    %17 = vector.broadcast %5 : vector<1x256xi32> to vector<8x256xi32>
    %18 = arith.cmpi eq, %16, %17 : vector<8x256xi32>
    %cst_8 = arith.constant dense<0.000000e+00> : vector<256xf32>
    %19 = vector.multi_reduction <add>, %13, %cst_8 [0] : vector<8x256xf32> to vector<256xf32>
    %20 = vector.shape_cast %19 : vector<256xf32> to vector<1x256xf32>
    %cst_9 = arith.constant 0.000000e+00 : f32
    %21 = vector.broadcast %cst_9 : f32 to vector<8x256xf32>
    %22 = arith.select %18, %1, %21 : vector<8x256xi1>, vector<8x256xf32>
    %cst_10 = arith.constant dense<0.000000e+00> : vector<256xf32>
    %23 = vector.multi_reduction <add>, %22, %cst_10 [0] : vector<8x256xf32> to vector<256xf32>
    %24 = vector.shape_cast %23 : vector<256xf32> to vector<1x256xf32>
    %cst_11 = arith.constant 0.000000e+00 : f32
    %25 = vector.broadcast %cst_11 : f32 to vector<8x256xf32>
    %26 = arith.select %18, %13, %25 : vector<8x256xi1>, vector<8x256xf32>
    %cst_12 = arith.constant dense<0.000000e+00> : vector<256xf32>
    %27 = vector.multi_reduction <add>, %26, %cst_12 [0] : vector<8x256xf32> to vector<256xf32>
    %28 = vector.shape_cast %27 : vector<256xf32> to vector<1x256xf32>
    %29 = arith.subf %3, %10 : vector<1x256xf32>
    %30 = math.exp %29 : vector<1x256xf32>
    %31 = tpu.iota {dimensions = array<i32: 0>} : vector<1x256xi32>
    %c8_i32 = arith.constant 8 : i32
    %32 = vector.broadcast %c8_i32 : i32 to vector<1x256xi32>
    %33 = arith.addi %31, %32 : vector<1x256xi32>
    %34 = arith.cmpi eq, %33, %5 : vector<1x256xi32>
    %cst_13 = arith.constant dense<0.000000e+00> : vector<256xf32>
    %35 = vector.multi_reduction <add>, %30, %cst_13 [0] : vector<1x256xf32> to vector<256xf32>
    %36 = vector.shape_cast %35 : vector<256xf32> to vector<1x256xf32>
    %cst_14 = arith.constant 0.000000e+00 : f32
    %37 = vector.broadcast %cst_14 : f32 to vector<1x256xf32>
    %38 = arith.select %34, %3, %37 : vector<1x256xi1>, vector<1x256xf32>
    %cst_15 = arith.constant dense<0.000000e+00> : vector<256xf32>
    %39 = vector.multi_reduction <add>, %38, %cst_15 [0] : vector<1x256xf32> to vector<256xf32>
    %40 = vector.shape_cast %39 : vector<256xf32> to vector<1x256xf32>
    %cst_16 = arith.constant 0.000000e+00 : f32
    %41 = vector.broadcast %cst_16 : f32 to vector<1x256xf32>
    %42 = arith.select %34, %30, %41 : vector<1x256xi1>, vector<1x256xf32>
    %cst_17 = arith.constant dense<0.000000e+00> : vector<256xf32>
    %43 = vector.multi_reduction <add>, %42, %cst_17 [0] : vector<1x256xf32> to vector<256xf32>
    %44 = vector.shape_cast %43 : vector<256xf32> to vector<1x256xf32>
    %45 = arith.addf %20, %36 : vector<1x256xf32>
    %46 = arith.addf %24, %40 : vector<1x256xf32>
    %47 = arith.addf %28, %44 : vector<1x256xf32>
    %48 = math.log %45 : vector<1x256xf32>
    %49 = arith.addf %10, %48 : vector<1x256xf32>
    %50 = arith.subf %46, %49 : vector<1x256xf32>
    %51 = tpu.reciprocal %45 {approx = true} : vector<1x256xf32> -> vector<1x256xf32>
    %52 = arith.mulf %47, %51 : vector<1x256xf32>
    %cst_18 = arith.constant 1.000000e+00 : f32
    %53 = vector.broadcast %cst_18 : f32 to vector<1x256xf32>
    %54 = arith.subf %53, %52 : vector<1x256xf32>
    %55 = arith.mulf %54, %54 : vector<1x256xf32>
    %cst_19 = arith.constant -2.500000e-01 : f32
    %56 = vector.broadcast %cst_19 : f32 to vector<1x256xf32>
    %57 = arith.mulf %56, %55 : vector<1x256xf32>
    %58 = arith.mulf %57, %50 : vector<1x256xf32>
    %59 = tpu.iota {dimensions = array<i32: 1>} : vector<1x256xi32>
    %c256_i32 = arith.constant 256 : i32
    %60 = arith.muli %arg1, %c256_i32 : i32
    %61 = vector.broadcast %60 : i32 to vector<1x256xi32>
    %62 = arith.addi %61, %59 : vector<1x256xi32>
    %c256_i32_20 = arith.constant 256 : i32
    %63 = vector.broadcast %c256_i32_20 : i32 to vector<1x256xi32>
    %64 = arith.cmpi slt, %62, %63 : vector<1x256xi32>
    %cst_21 = arith.constant 0.000000e+00 : f32
    %65 = vector.broadcast %cst_21 : f32 to vector<1x256xf32>
    %66 = arith.select %64, %58, %65 : vector<1x256xi1>, vector<1x256xf32>
    %c0_22 = arith.constant 0 : index
    %c0_23 = arith.constant 0 : index
    %c0_24 = arith.constant 0 : index
    %67 = vector.load %arg4[%c0_22, %c0_23, %c0_24] : memref<1x1x256xf32, #tpu.memory_space<vmem>>, vector<1x1x256xf32>
    %68 = vector.shape_cast %67 : vector<1x1x256xf32> to vector<1x256xf32>
    %cst_25 = arith.constant 0.000000e+00 : f32
    %69 = vector.broadcast %cst_25 : f32 to vector<1x256xf32>
    %70 = arith.select %64, %68, %69 : vector<1x256xi1>, vector<1x256xf32>
    %71 = arith.mulf %70, %66 : vector<1x256xf32>
    %72 = vector.shape_cast %71 : vector<1x256xf32> to vector<1x1x1x256xf32>
    %c0_26 = arith.constant 0 : index
    %c0_27 = arith.constant 0 : index
    %c0_28 = arith.constant 0 : index
    %c0_29 = arith.constant 0 : index
    %73 = vector.load %arg5[%c0_26, %c0_27, %c0_28, %c0_29] : memref<1x1x1x256xf32, #tpu.memory_space<vmem>>, vector<1x1x1x256xf32>
    tpu.vector_store %arg5[%c0_26, %c0_27, %c0_28, %c0_29], %72 {strides = array<i32>} : memref<1x1x1x256xf32, #tpu.memory_space<vmem>>, vector<1x1x1x256xf32>,
    %74 = vector.shape_cast %66 : vector<1x256xf32> to vector<1x1x1x256xf32>
    %c0_30 = arith.constant 0 : index
    %c0_31 = arith.constant 0 : index
    %c0_32 = arith.constant 0 : index
    %c0_33 = arith.constant 0 : index
    %75 = vector.load %arg6[%c0_30, %c0_31, %c0_32, %c0_33] : memref<1x1x1x256xf32, #tpu.memory_space<vmem>>, vector<1x1x1x256xf32>
    tpu.vector_store %arg6[%c0_30, %c0_31, %c0_32, %c0_33], %74 {strides = array<i32>} : memref<1x1x1x256xf32, #tpu.memory_space<vmem>>, vector<1x1x1x256xf32>,
    return
  }
  func.func @transform_0(%arg0: i32, %arg1: i32) -> (i32, i32, i32) {
    %c0_i32 = arith.constant 0 : i32
    %c0_i32_0 = arith.constant 0 : i32
    return %arg0, %c0_i32, %arg1 : i32, i32, i32
  }
  func.func @transform_1(%arg0: i32, %arg1: i32) -> (i32, i32, i32) {
    %c0_i32 = arith.constant 0 : i32
    %c0_i32_0 = arith.constant 0 : i32
    return %arg0, %c0_i32, %arg1 : i32, i32, i32
  }
  func.func @transform_2(%arg0: i32, %arg1: i32) -> (i32, i32, i32) {
    %c0_i32 = arith.constant 0 : i32
    %c0_i32_0 = arith.constant 0 : i32
    return %arg0, %c0_i32, %arg1 : i32, i32, i32
  }
  func.func @transform_3(%arg0: i32, %arg1: i32) -> (i32, i32, i32, i32) {
    %c0_i32 = arith.constant 0 : i32
    %c0_i32_0 = arith.constant 0 : i32
    %c0_i32_1 = arith.constant 0 : i32
    return %arg0, %arg1, %c0_i32, %c0_i32_0 : i32, i32, i32, i32
  }
  func.func @transform_4(%arg0: i32, %arg1: i32) -> (i32, i32, i32, i32) {
    %c0_i32 = arith.constant 0 : i32
    %c0_i32_0 = arith.constant 0 : i32
    %c0_i32_1 = arith.constant 0 : i32
    return %arg0, %arg1, %c0_i32, %c0_i32_0 : i32, i32, i32, i32
  }
}

</mosaic_0001>

<bundles_post_ra>
// kernel: tpu_custom_call.1
= control target key start
LH: loop header
LB: loop body
LE: loop exit
PB: predicated region body
PF: predicated region fallthrough
CT: control target
= control target key end

     0   :  { %10 = vsyncpa [#allocation3], 0  ;;  %s1197_s0 = inlined_call_operand.vmem [shape: f32[2,9,256], index: 0, kind: input, shape index: {}]   ;;  %s1198_s1 = inlined_call_operand.vmem [shape: s32[2,1,256], index: 1, kind: input, shape index: {}]   ;;  %s1199_s2 = inlined_call_operand.vmem [shape: f32[2,1,256], index: 2, kind: input, shape index: {}]   ;;  %s1200_s3 = inlined_call_operand.hbm [shape: f32[2,1,1,256], index: 3, kind: output, shape index: {0}]   ;;  %s1201_s4 = inlined_call_operand.hbm [shape: f32[2,1,1,256], index: 4, kind: output, shape index: {1}]  }
   0x1   :  { %12 = vsyncpa [#allocation3 + $0x1], 0 }
   0x2   :  { %13 = vsyncpa [#allocation5], 0 }
   0x3   :  { %15 = vsyncpa [#allocation5 + $0x1], 0  ;;  %s968_s15 = smov 0   ;;  %s970_s16 = smov 0  }
   0x4   :  { %s972_s17 = smov 0   ;;  %s974_s18 = smov 0  }
   0x5   :  { %s976_s19 = smov 0   ;;  %s978_s20 = smov 0  }
   0x6 LB: > { %s730_s21 = sadd.s32 4294967295, %s938_s20   ;;  %s731_s22 = sadd.s32 4294967294, %s938_s20   ;;  %s938_s20 = sphi %s978_s20, %s21_s20   ;;  %s934_s19 = sphi %s976_s19, %s1210_s19   ;;  %s930_s18 = sphi %s974_s18, %s1209_s18   ;;  %s926_s17 = sphi %s972_s17, %s1208_s17   ;;  %s922_s16 = sphi %s970_s16, %s1207_s16   ;;  %s918_s15 = sphi %s968_s15, %s1206_s15  }
   0x7   : > { %s33_s23 = sadd.s32 1, %s934_s19  ;;  %s126_s24 = sadd.s32 1, %s926_s17 }
   0x8   : > { %p35_p0 = scmp.ge.s32.totalorder %s33_s23, 2  ;;  %p136_p1 = scmp.ne.s32.totalorder %s926_s17, %s922_s16 }
   0x9   : > { %p137_p2 = scmp.eq.s32.totalorder %s730_s21, 1  ;;  %p142_p3 = scmp.ne.s32.totalorder %s922_s16, %s918_s15 }
   0xa   : > { %s1212_s23 = smov (%p35_p0, %s33_s23), 0  ;;  %p143_p5 = scmp.eq.s32.totalorder %s731_s22, 1 }
   0xb   : > { %p1008_p4 = por %p137_p2, %p136_p1  ;;  %s121_s26 = ssub.s32 %s934_s19, %s1212_s23 }
   0xc   : > { %p734_p6 = scmp.ge.s32.totalorder %s938_s20, 1  ;;  %p124_p7 = scmp.eq.s32.totalorder %s121_s26, 0 }
   0xd   : > { %p1015_p8 = por %p143_p5, %p142_p3  ;;  %p226_p9 = scmp.lt.s32.totalorder %s938_s20, 3 }
   0xe   : > { %s1021_s28 = scalar_select %p124_p7, %s926_s17, %s126_s24  }
   0xf   : > { %p227_p10 = pnand %p734_p6, %p226_p9 }
  0x10   : > { %p278_p11 = scmp.lt.s32.totalorder (!%p227_p10), %s930_s18, 1  ;;  %v323_v0 = vlaneseq (!%p227_p10)  ;;  %v940_v8 = vmov (!%p227_p10), 1966171168   ;;  %s1094_s21 = sand.u32 (!%p227_p10), 1, %s922_s16  }
  0x11   : > { %230 = sbr.rel (%p227_p10) target bundleno = 141 (0x8d), region = 32  ;;  %v405_v9 = vunpack.c.l.s4 (!%p227_p10), %v940_v8  ;;  %s735_s22 = sshll.u32 (!%p227_p10), %s1094_s21, 1 }
  0x12   : > { %v1032_v5 = vshrl.u32 (!%p227_p10), %v323_v0, 7  ;;  %s276_s24 = scalar_lea.vmem (!%p227_p10), [#allocation4], %s735_s22  ;;  %vm1102_vm4 = vcmp.lt.s32.totalorder (!%p227_p10), %v323_v0, 256  ;;  %s941_s13 = smov (!%p227_p10), [#allocation4]  }
  0x13   : > { %v406_v17 = vunpack.c.0.s8 (!%p227_p10), %v405_v9  ;;  %s589_s26 = sshll.u32 (!%p227_p10), %s276_s24, 4  ;;  %s1109_s26 = int_to_ptr.vmem [resolvable:$true] %s589_s26 }
  0x14   : > { %v1035_v12 = vsub.s32 (!%p227_p10), 0, %v1032_v5  ;;  %v1038_v13 = vsub.s32 (!%p227_p10), 1, %v1032_v5  ;;  %s828_s12 = scalar_lea.vmem (!%p227_p10), %s1109_s26, 32 }
  0x15   : > { %v1053_v26 = vsub.s32 (!%p227_p10), %v406_v17, %v1032_v5  ;;  %v422_v17 = vadd.s32 (!%p227_p10), 8, %v1032_v5  ;;  %p829_p12 = scmp.ne.s32.totalorder (!%p227_p10), %s1109_s26, %s828_s12 }
  0x17   : > { %p830_p13 = pnand (!%p227_p10), %p829_p12, %p1008_p4 }
  0x18   : > { %s1025_s29 = scalar_select %p278_p11, %s930_s18, 1 }
  0x19   : > { %p831_p0 = pneg %p830_p13 }
  0x1a   : > { %s750_s30 = sshll.u32 %s1025_s29, 5  ;;  %s739_s8 = sshll.u32 %s1025_s29, 1 }
  0x1b   : > { %s285_s7 = scalar_lea.vmem %s1197_s0, %s750_s30  ;;  %s294_s11 = scalar_lea.vmem %s1198_s1, %s739_s8 }
  0x1c   : > { %v305_v1 = vld [vmem:[%s285_s7] sm:$0xff]  ;;  %v306_v2 = vld [vmem:[%s285_s7 + $0x8] sm:$0xff]  ;;  %v741_v14 = vld [vmem:[%s285_s7 + $0x10] ss:$8 sm:$0x3]  ;;  %s303_s14 = scalar_lea.vmem %s1199_s2, %s739_s8  ;;  %s751_s29 = sshll.u32 %s930_s18, 5 }
  0x1d   : > { %v310_v3 = vrot.slane %v305_v1, 4  ;;  %v316_v4 = vrot.slane %v306_v2, 4  ;;  %v1041_v20 = vrot.slane %v741_v14, %v1035_v12  ;;  %v1044_v21 = vrot.slane %v741_v14, %v1038_v13  ;;  %v309_v37 = vld [vmem:[%s294_s11] sm:$0x3]  ;;  %s1106_s30 = scalar_lea.vmem [#allocation2], %s735_s22  ;;  %s1116_s7 = scalar_lea.hbm %s1201_s4, %s751_s29 }
  0x1e   : > { %v1070_v39 = vrot.slane %v309_v37, %v1035_v12  ;;  %v1073_v40 = vrot.slane %v309_v37, %v1038_v13  ;;  %s573_s5 = sshll.u32 %s1106_s30, 4  ;;  %s1126_s10 = scalar_lea.hbm %s1200_s3, %s751_s29  ;;  %s1119_s5 = int_to_ptr.vmem [resolvable:$true] %s573_s5 }
  0x1f   : > { %v311_v6 = vmax.f32 %v305_v1, %v310_v3  ;;  %v317_v7 = vmax.f32 %v306_v2, %v316_v4  ;;  %s557_s11 = scalar_lea.sflag [#allocation5], %s1094_s21 }
  0x20   : > { %vm359_vm0 = vcmp.eq.s32.totalorder %v1032_v5, %v1070_v39  ;;  %vm360_vm1 = vcmp.eq.s32.totalorder %v1032_v5, %v1073_v40  ;;  %vm423_vm2 = vcmp.eq.s32.totalorder %v422_v17, %v1070_v39  ;;  %vm424_vm3 = vcmp.eq.s32.totalorder %v422_v17, %v1073_v40 }
  0x21   : > { %v312_v10 = vrot.slane %v311_v6, 2  ;;  %v318_v11 = vrot.slane %v317_v7, 2  ;;  %v373_v44 = vsel %vm359_vm0, %v305_v1, 0.0  ;;  %v374_v47 = vsel %vm360_vm1, %v306_v2, 0.0 }
  0x22   : > { %v375_v53 = vrot.slane %v373_v44, 4  ;;  %v381_v56 = vrot.slane %v374_v47, 4  ;;  %v426_v37 = vsel %vm423_vm2, %v1041_v20, 0.0  ;;  %v427_v39 = vsel %vm424_vm3, %v1044_v21, 0.0 }
  0x23   : > { %v313_v15 = vmax.f32 %v311_v6, %v312_v10  ;;  %v319_v16 = vmax.f32 %v317_v7, %v318_v11 }
  0x24   : > { %v376_v62 = vadd.f32 %v375_v53, %v373_v44  ;;  %v382_v3 = vadd.f32 %v381_v56, %v374_v47 }
  0x25   : > { %v314_v18 = vrot.slane %v313_v15, 1  ;;  %v320_v19 = vrot.slane %v319_v16, 1 }
  0x26   : > { %v377_v10 = vrot.slane %v376_v62, 2 }
  0x27   : > { %v315_v22 = vmax.f32 %v313_v15, %v314_v18  ;;  %v321_v23 = vmax.f32 %v319_v16, %v320_v19 }
  0x28   : > { %v378_v19 = vadd.f32 %v377_v10, %v376_v62 }
  0x29   : > { %v1047_v24 = vmax.f32 %v315_v22, %v1041_v20  ;;  %v1050_v25 = vmax.f32 %v321_v23, %v1044_v21 }
  0x2b   : > { %v338_v27 = vrot.slane %v1047_v24, %v1035_v12  ;;  %v342_v28 = vrot.slane %v1050_v25, %v1035_v12  ;;  %v403_v29 = vcombine.low %v1047_v24, %v1050_v25 }
  0x2d   : > { %v343_v30 = vsub.f32 %v305_v1, %v338_v27  ;;  %v344_v31 = vsub.f32 %v306_v2, %v342_v28  ;;  %v410_v32 = vrot.slane %v403_v29, %v1053_v26  ;;  %v379_v28 = vrot.slane %v378_v19, 1 }
  0x2f   : > { %v345_v33 = vmul.f32 1.442695, %v343_v30  ;;  %v347_v34 = vmul.f32 1.442695, %v344_v31  ;;  %v417_v35 = vrot.slane %v410_v32, %v1053_v26 }
  0x31   : > { %814 = vpow2.f32 %v345_v33  ;;  %v419_v36 = vsub.f32 %v741_v14, %v417_v35  ;;  %v383_v14 = vrot.slane %v382_v3, 2  ;;  %v380_v33 = vadd.f32 %v379_v28, %v378_v19 }
  0x32   : > { %816 = vpow2.f32 %v347_v34 }
  0x33   : > { %v420_v38 = vmul.f32 1.442695, %v419_v36  ;;  %v384_v23 = vadd.f32 %v383_v14, %v382_v3 }
  0x35   : > { %818 = vpow2.f32 %v420_v38  ;;  %v385_v30 = vrot.slane %v384_v23, 1 }
  0x37   : > { %v386_v36 = vadd.f32 %v385_v30, %v384_v23 }
  0x3b   : > { %v815_v41 = vpop.eup %814 }
  0x3c   : > { %v817_v42 = vpop.eup %816  ;;  %v361_v43 = vrot.slane %v815_v41, 4  ;;  %v387_v45 = vsel %vm359_vm0, %v815_v41, 0.0 }
  0x3d   : > { %v367_v46 = vrot.slane %v817_v42, 4  ;;  %v388_v48 = vsel %vm360_vm1, %v817_v42, 0.0  ;;  %v389_v49 = vrot.slane %v387_v45, 4 }
  0x3e   : > { %v362_v50 = vadd.f32 %v815_v41, %v361_v43  ;;  %v395_v51 = vrot.slane %v388_v48, 4 }
  0x3f   : > { %v368_v52 = vadd.f32 %v817_v42, %v367_v46  ;;  %v390_v54 = vadd.f32 %v389_v49, %v387_v45  ;;  %v819_v58 = vpop.eup %818  ;;  %v458_v45 = vadd.f32 %v426_v37, %v380_v33 }
  0x40   : > { %v363_v55 = vrot.slane %v362_v50, 2  ;;  %v396_v57 = vadd.f32 %v395_v51, %v388_v48  ;;  %v434_v2 = vrot.slane %v819_v58, %v1035_v12  ;;  %v438_v7 = vrot.slane %v819_v58, %v1038_v13  ;;  %v493_v51 = vld [vmem:[%s303_s14] sm:$0x3]  ;;  %s832_s14 = sshll.u32 %s941_s13, 4  ;;  %s833_s14 = int_to_ptr.vmem [resolvable:$false] %s832_s14 }
  0x41   : > { %v369_v59 = vrot.slane %v368_v52, 2  ;;  %v391_v63 = vrot.slane %v390_v54, 2  ;;  %v459_v48 = vadd.f32 %v427_v39, %v386_v36  ;;  %v502_v58 = vrot.slane %v493_v51, %v1038_v13  ;;  %s834_s22 = scalar_lea.vmem %s833_s14, 64  ;;  %p835_p1 = scmp.lt.s32.totalorder %s1109_s26, %s833_s14 }
  0x42   : > { %v364_v60 = vadd.f32 %v363_v55, %v362_v50  ;;  %v397_v4 = vrot.slane %v396_v57, 2  ;;  %v441_v32 = vsel %vm423_vm2, %v434_v2, 0.0  ;;  %v442_v5 = vsel %vm424_vm3, %v438_v7, 0.0  ;;  %p836_p2 = scmp.lt.s32.totalorder %s834_s22, %s828_s12 }
  0x43   : > { %v370_v61 = vadd.f32 %v369_v59, %v368_v52  ;;  %v392_v11 = vadd.f32 %v391_v63, %v390_v54 }
  0x44   : > { %v365_v1 = vrot.slane %v364_v60, 1  ;;  %v398_v15 = vadd.f32 %v397_v4, %v396_v57  ;;  %p837_p3 = por %p836_p2, %p835_p1 }
  0x45   : > { %v371_v6 = vrot.slane %v370_v61, 1  ;;  %v393_v22 = vrot.slane %v392_v11, 1 }
  0x46   : > { %v366_v8 = vadd.f32 %v365_v1, %v364_v60  ;;  %v399_v27 = vrot.slane %v398_v15, 1  ;;  %p838_p5 = pnand %p837_p3, %p831_p0 }
  0x47   : > { %v372_v9 = vadd.f32 %v371_v6, %v370_v61  ;;  %v394_v29 = vadd.f32 %v393_v22, %v392_v11 }
  0x48   : > { %v456_v16 = vadd.f32 %v434_v2, %v366_v8  ;;  %v400_v31 = vadd.f32 %v399_v27, %v398_v15 }
  0x49   : > { %v457_v18 = vadd.f32 %v438_v7, %v372_v9  ;;  %v460_v34 = vadd.f32 %v441_v32, %v394_v29 }
  0x4a   : > { %820 = vlog2.f32 %v456_v16  ;;  %v461_v38 = vadd.f32 %v442_v5, %v400_v31 }
  0x4b   : > { %822 = vlog2.f32 %v457_v18 }
  0x4c   : > { %824 = vrcp.f32 %v456_v16 }
  0x4d   : > { %826 = vrcp.f32 %v457_v18 }
  0x54   : > { %v821_v35 = vpop.eup %820 }
  0x55   : > { %v823_v41 = vpop.eup %822  ;;  %v463_v42 = vmul.f32 0.6931472, %v821_v35 }
  0x56   : > { %v825_v40 = vpop.eup %824  ;;  %v465_v43 = vmul.f32 0.6931472, %v823_v41 }
  0x57   : > { %v827_v44 = vpop.eup %826  ;;  %v466_v46 = vadd.f32 %v463_v42, %v1047_v24  ;;  %v472_v47 = vmul.f32 %v825_v40, %v460_v34  ;;  %v498_v24 = vrot.slane %v493_v51, %v1035_v12 }
  0x58   : > { %v467_v20 = vadd.f32 %v465_v43, %v1050_v25  ;;  %v473_v49 = vmul.f32 %v827_v44, %v461_v38 }
  0x59   : > { %v474_v21 = vsub.f32 1.0, %v472_v47  ;;  %v468_v52 = vsub.f32 %v458_v45, %v466_v46 }
  0x5a   : > { %v475_v50 = vsub.f32 1.0, %v473_v49  ;;  %v469_v54 = vsub.f32 %v459_v48, %v467_v20 }
  0x5b   : > { %v476_v53 = vmul.f32 %v474_v21, %v474_v21 }
  0x5c   : > { %v477_v55 = vmul.f32 %v475_v50, %v475_v50 }
  0x5d   : > { %v478_v56 = vmul.f32 -0.25, %v476_v53 }
  0x5e   : > { %v479_v57 = vmul.f32 -0.25, %v477_v55 }
  0x5f   : > { %v480_v25 = vmul.f32 %v478_v56, %v468_v52 }
  0x60   : > { %v481_v59 = vmul.f32 %v479_v57, %v469_v54 }
  0x61   : > { %v507_v60 = vmul.f32 %v498_v24, %v480_v25 }
  0x62   : > { %v508_v61 = vmul.f32 %v502_v58, %v481_v59  ;;  %v534_v62 = vcombine.low %v480_v25, %v481_v59 }
  0x64   : > { %v511_v63 = vcombine.low %v507_v60, %v508_v61  ;;  %v541_v1 = vrot.slane %v534_v62, %v1053_v26 }
  0x66   : > { %v518_v12 = vrot.slane %v511_v63, %v1053_v26  ;;  %v548_v13 = vrot.slane %v541_v1, %v1053_v26 }
  0x68   : > { %v525_v0 = vrot.slane %v518_v12, %v1053_v26  ;;  %550 = vst.msk [vmem:[%s276_s24] sm:$0x3] %vm1102_vm4, %v548_v13 }
  0x69   : > { %841 = shalt.err (!%p838_p5)
}
  0x6a   : > { %s842_s24 = scalar_lea.hbm %s1116_s7, 32  ;;  %s846_s6 = scalar_lea.hbm %s1201_s4, 64 }
  0x6b   : > { %p843_p6 = scmp.ne.s32.totalorder %s1116_s7, %s842_s24  ;;  %p847_p10 = scmp.lt.u32.totalorder %s1116_s7, %s1201_s4 }
  0x6c   : > { %p848_p11 = scmp.lt.u32.totalorder %s846_s6, %s842_s24  ;;  %p850_p13 = scmp.lt.u32.totalorder %s842_s24, %s1116_s7 }
  0x6d   : > { %p844_p7 = pnand %p843_p6, %p1008_p4 }
  0x6e   : > { %p849_p12 = por %p848_p11, %p847_p10 }
  0x6f   : > { %p845_p9 = pneg %p844_p7 }
  0x70   : > { %p851_p0 = por %p850_p13, %p849_p12 }
  0x72   : > { %p852_p1 = pnand %p851_p0, %p845_p9 }
  0x74   : > { %855 = shalt.err (!%p852_p1)
}
  0x75   : > { %754 = dma.vmem_to_hbm [thread:$0]  (%p1008_p4), %s1109_s26, 32, %s1116_s7, %s557_s11   ;;  %531 = vst.msk [vmem:[%s1106_s30] sm:$0x3] %vm1102_vm4, %v525_v0 }
  0x76   : > { %s552_s12 = scalar_lea.sflag [#allocation3], %s1094_s21  ;;  %s856_s13 = scalar_lea.vmem %s1119_s5, 32 }
  0x77   : > { %p857_p2 = scmp.ne.s32.totalorder %s1119_s5, %s856_s13  ;;  %s942_s14 = smov [#allocation2]  }
  0x78   : > { %s860_s22 = sshll.u32 %s942_s14, 4  ;;  %s861_s22 = int_to_ptr.vmem [resolvable:$false] %s860_s22 }
  0x79   : > { %p858_p3 = pnand %p857_p2, %p1008_p4  ;;  %s862_s24 = scalar_lea.vmem %s861_s22, 64 }
  0x7a   : > { %p863_p6 = scmp.lt.s32.totalorder %s1119_s5, %s861_s22  ;;  %p864_p7 = scmp.lt.s32.totalorder %s862_s24, %s856_s13 }
  0x7b   : > { %p859_p5 = pneg %p858_p3 }
  0x7c   : > { %p865_p9 = por %p864_p7, %p863_p6 }
  0x7e   : > { %p866_p10 = pnand %p865_p9, %p859_p5 }
  0x80   : > { %869 = shalt.err (!%p866_p10)
}
  0x81   : > { %s870_s21 = scalar_lea.hbm %s1126_s10, 32  ;;  %s874_s7 = scalar_lea.hbm %s1200_s3, 64 }
  0x82   : > { %p871_p11 = scmp.ne.s32.totalorder %s1126_s10, %s870_s21  ;;  %p875_p0 = scmp.lt.u32.totalorder %s1126_s10, %s1200_s3 }
  0x83   : > { %p876_p1 = scmp.lt.u32.totalorder %s874_s7, %s870_s21  ;;  %p878_p3 = scmp.lt.u32.totalorder %s870_s21, %s1126_s10 }
  0x84   : > { %p872_p12 = pnand %p871_p11, %p1008_p4 }
  0x85   : > { %p877_p2 = por %p876_p1, %p875_p0 }
  0x86   : > { %p873_p13 = pneg %p872_p12 }
  0x87   : > { %p879_p5 = por %p878_p3, %p877_p2 }
  0x89   : > { %p880_p6 = pnand %p879_p5, %p873_p13 }
  0x8b   : > { %883 = shalt.err (!%p880_p6)
}
  0x8c   : > { %753 = dma.vmem_to_hbm [thread:$0]  (%p1008_p4), %s1119_s5, 32, %s1126_s10, %s552_s12  }
  0x8d PF: > { %p764_p7 = scmp.ge.s32.totalorder %s938_s20, 2  ;;  %s601_s18 = sand.u32 1, %s918_s15  }
  0x8e   : > { %s602_s6 = scalar_lea.sflag [#allocation3], %s601_s18 }
  0x8f   : > { %p758_p9 = pnand %p764_p7, %p1015_p8 }
  0x91   : > { %909 = dma.done.wait (!%p758_p9), %s602_s6, 32  }
  0x92   : > { %911 = vsyncadd (!%p758_p9), %s602_s6, 4294967264  ;;  %s611_s8 = scalar_lea.sflag [#allocation5], %s601_s18 }
  0x93   : > { %913 = dma.done.wait (!%p758_p9), %s611_s8, 32  }
  0x94   : > { %915 = vsyncadd (!%p758_p9), %s611_s8, 4294967264  ;;  %s21_s20 = sadd.s32 1, %s938_s20   ;;  %s1206_s15 = smov %s922_s16 }
  0x95   : > { %p18_p10 = scmp.ge.s32.totalorder %s21_s20, 4   ;;  %s1207_s16 = smov %s926_s17 }
  0x96   : > { %s1208_s17 = smov %s1021_s28  ;;  %s1209_s18 = smov %s934_s19 }
  0x97   : > { %s1210_s19 = smov %s1212_s23  ;;  %20 = sbr.rel (!%p18_p10) target bundleno = 6 (0x6), region = 91 }
  0x9e   :  { %616 = vsyncpa [#allocation3], 1 }
  0x9f   :  { %618 = vsyncpa [#allocation3 + $0x1], 1 }
  0xa0   :  { %619 = vsyncpa [#allocation5], 1 }
  0xa1   :  { %621 = vsyncpa [#allocation5 + $0x1], 1 }

</bundles_post_ra>
